<compile_context>
chip_gen: v6e
topology: v6e:2x2x1
jax: 0.10.0
libtpu: 0.0.40
codegen_flags: <defaults>
</compile_context>

<pallas_src>
import functools

import jax
import jax.numpy as jnp
import numpy as np
from jax.experimental import pallas as pl
from jax.experimental.pallas import tpu as pltpu

_LANES = 128


def _int_pow(x, n):
    """x**n for a static non-negative integer n via repeated squaring (VPU only)."""
    if n == 0:
        return jnp.ones_like(x)
    result = None
    cur = x
    while n:
        if n & 1:
            result = cur if result is None else result * cur
        n >>= 1
        if n:
            cur = cur * cur
    return result


def _asl_kernel(x_ref, t_ref, out_ref, *, gamma_pos, gamma_neg, eps, batch,
                block_rows):
    i = pl.program_id(0)
    x = x_ref[...].astype(jnp.float32)            # (TB, C) logits (f32 in-reg)
    t = t_ref[...]                                # (TB, 1) int32 class ids
    TB, C = x.shape

    # ---- log_softmax over classes; one exp, one log, one reciprocal per row -
    m = jnp.max(x, axis=-1, keepdims=True)
    shifted = x - m
    p_un = jnp.exp(shifted)                               # unnormalized probs
    denom = jnp.sum(p_un, axis=-1, keepdims=True)         # (TB, 1)
    inv = pl.reciprocal(denom, approx=False)              # per-row, exact-ish
    log_preds = shifted - jnp.log(denom)                  # one log per row

    # ---- one-hot via iota compare (== torch scatter_) -----------------------
    cls_ids = jax.lax.broadcasted_iota(jnp.int32, (TB, C), dimension=1)
    is_target = cls_ids == t                              # (TB, C) bool

    eps_c = eps / C
    int_gammas = (float(gamma_pos).is_integer() and float(gamma_neg).is_integer()
                  and gamma_pos >= 0 and gamma_neg >= 0)

    if int_gammas:
        # Integer exponents -> pure VPU multiplies; reproduces torch pow(0,0)=1.
        gp, gn = int(gamma_pos), int(gamma_neg)
        if eps > 0:
            # tc * asym_w = (eps/C) * where(is_target, k_t * w_pos, w_neg)
            k_t = (1.0 - eps + eps_c) / eps_c
            if gp == 0:
                # Never materialize prob: w_neg = p_un**gn, fold inv**gn into
                # a per-row factor (denom**gn compensates on the target branch).
                denom_gn = _int_pow(denom, gn)            # (TB, 1)
                inv_gn = _int_pow(inv, gn)                # (TB, 1)
                w = jnp.where(is_target, k_t * denom_gn, _int_pow(p_un, gn))
                row = jnp.sum(w * log_preds, axis=-1, keepdims=True) * inv_gn
            else:
                prob = p_un * inv
                w = jnp.where(is_target, k_t * _int_pow(1.0 - prob, gp),
                              _int_pow(prob, gn))
                row = jnp.sum(w * log_preds, axis=-1, keepdims=True)
            loss_rows = -eps_c * row                      # (TB, 1)
        else:
            # eps == 0: only the target column contributes (tc is one-hot).
            if gp == 0:
                w = jnp.where(is_target, log_preds, 0.0)
            else:
                prob = p_un * inv
                w = jnp.where(is_target,
                              _int_pow(1.0 - prob, gp) * log_preds, 0.0)
            loss_rows = -jnp.sum(w, axis=-1, keepdims=True)
    else:
        # General (non-integer gamma) fallback: exp(gamma * log(base)).
        prob = p_un * inv
        base = jnp.where(is_target, 1.0 - prob, prob)
        base = jnp.maximum(base, jnp.finfo(jnp.float32).tiny)  # avoid log(0) NaN
        gamma = jnp.where(is_target, jnp.float32(gamma_pos),
                          jnp.float32(gamma_neg))
        asym_w = jnp.power(base, gamma)
        if eps > 0:
            tc = jnp.where(is_target, 1.0 - eps + eps_c, eps_c)
        else:
            tc = jnp.where(is_target, 1.0, 0.0)
        loss_rows = -jnp.sum(tc * asym_w * log_preds, axis=-1, keepdims=True)

    # Mask rows past the true batch (ragged last block reads are garbage).
    # Keep this a select: garbage rows may hold NaN/Inf.
    row_ids = i * block_rows + jax.lax.broadcasted_iota(jnp.int32, (TB, 1), 0)
    loss_rows = jnp.where(row_ids < batch, loss_rows, 0.0)

    partial = jnp.sum(loss_rows)
    out_ref[...] = jnp.broadcast_to(partial.reshape(1, 1, 1),
                                    (1, 8, _LANES))


def _sublane_multiple(dtype):
    """Sublane tiling multiple for the second-to-last dim of a block."""
    itemsize = jnp.dtype(dtype).itemsize
    return {4: 8, 2: 16, 1: 32}.get(itemsize, 8)


def _tiling_params():
    """(target_tile_bytes, vmem_limit_bytes, min_blocks), generation aware."""
    try:
        cap = int(pltpu.get_tpu_info().vmem_capacity_bytes)
    except Exception:  # unknown / query unsupported -> conservative defaults
        cap = 0
    if cap >= 100 * 1024 * 1024:
        # 128 MiB VMEM parts (v5e / v6e): bigger tiles amortize per-step cost.
        return 8 * 1024 * 1024, 64 * 1024 * 1024, 2
    # v7x-class (64 MiB / TC) or unknown: stay conservative.
    return 4 * 1024 * 1024, 32 * 1024 * 1024, 2


def _choose_block_rows(batch, num_classes, dtype, *, target_tile_bytes,
                       min_blocks):
    """Batch tile sized from the *padded* VMEM footprint of the logits tile,
    rounded to the dtype-dependent sublane multiple, capped so that the grid
    has >= min_blocks blocks whenever the batch allows (v7x megacore)."""
    sub = _sublane_multiple(dtype)
    padded_c = pl.cdiv(num_classes, _LANES) * _LANES
    bytes_per_row = padded_c * 4                 # f32 intermediates dominate
    tb = max(sub, target_tile_bytes // bytes_per_row)
    if min_blocks > 1 and batch > min_blocks * sub:
        cap = pl.cdiv(pl.cdiv(batch, min_blocks), sub) * sub
        tb = min(tb, cap)
    if tb >= batch:
        return batch                             # one full-dim block (legal)
    return max(sub, (tb // sub) * sub)           # sublane-aligned partial block


def asl_single_label(inputs, target, *, gamma_pos=0.0, gamma_neg=4.0, eps=0.1,
                     block_rows=None):
    """Pallas TPU implementation of ASLSingleLabel.forward (reduction='mean')."""
    B, C = inputs.shape
    t2 = target.astype(jnp.int32).reshape(B, 1)
    target_tile_bytes, vmem_limit, min_blocks = _tiling_params()
    if block_rows is None:
        block_rows = _choose_block_rows(B, C, inputs.dtype,
                                        target_tile_bytes=target_tile_bytes,
                                        min_blocks=min_blocks)
    num_blocks = pl.cdiv(B, block_rows)

    kernel = functools.partial(
        _asl_kernel,
        gamma_pos=float(gamma_pos),
        gamma_neg=float(gamma_neg),
        eps=float(eps),
        batch=B,
        block_rows=block_rows,
    )
    partials = pl.pallas_call(
        kernel,
        out_shape=jax.ShapeDtypeStruct((num_blocks, 8, _LANES), jnp.float32),
        grid=(num_blocks,),
        in_specs=[
            pl.BlockSpec((block_rows, C), lambda i: (i, 0)),
            pl.BlockSpec((block_rows, 1), lambda i: (i, 0)),
        ],
        out_specs=pl.BlockSpec((1, 8, _LANES), lambda i: (i, 0, 0)),
        compiler_params=pltpu.CompilerParams(
            dimension_semantics=("parallel",),
            vmem_limit_bytes=vmem_limit,
        ),
    )(inputs, t2)
    # Per-block partial sums; finish the (tiny) reduction + mean in XLA.
    return jnp.sum(partials[:, 0, 0]) / B


def _reference(inputs, target, gamma_pos=0.0, gamma_neg=4.0, eps=0.1):
    """Pure-JAX reference mirroring the PyTorch forward, for validation."""
    B, C = inputs.shape
    log_preds = jax.nn.log_softmax(inputs.astype(jnp.float32), axis=-1)
    targets = jax.nn.one_hot(target, C, dtype=jnp.float32)
    anti = 1.0 - targets
    xs_pos = jnp.exp(log_preds) * targets
    xs_neg = (1.0 - jnp.exp(log_preds)) * anti
    w = jnp.power(1.0 - xs_pos - xs_neg, gamma_pos * targets + gamma_neg * anti)
    log_preds = log_preds * w
    tc = targets * (1.0 - eps) + eps / C if eps > 0 else targets
    loss = -(tc * log_preds).sum(-1)
    return loss.mean()


if __name__ == "__main__":
    key = jax.random.PRNGKey(0)

    # Test 1: module-spec shapes, single batch tile, default gammas.
    k1, k2 = jax.random.split(key)
    B, C = 8, 32  # (batch_size, number_classes)
    inputs = jax.random.normal(k1, (B, C), dtype=jnp.float32)
    target = jax.random.randint(k2, (B,), 0, C, dtype=jnp.int32)
    loss = jax.block_until_ready(asl_single_label(inputs, target))
    ref = _reference(inputs, target)
    np.testing.assert_allclose(np.asarray(loss), np.asarray(ref),
                               rtol=1e-5, atol=1e-5)

    # Test 2: multi-block grid with a ragged last tile (masking path).
    k3, k4 = jax.random.split(k2)
    B2, C2 = 20, 32
    inputs2 = jax.random.normal(k3, (B2, C2), dtype=jnp.float32)
    target2 = jax.random.randint(k4, (B2,), 0, C2, dtype=jnp.int32)
    loss2 = jax.block_until_ready(
        asl_single_label(inputs2, target2, block_rows=8))
    ref2 = _reference(inputs2, target2)
    np.testing.assert_allclose(np.asarray(loss2), np.asarray(ref2),
                               rtol=1e-5, atol=1e-5)

    # Test 3: bf16 logits, dtype-aware (16-row) sublane rounding, 2 blocks.
    k5, k6 = jax.random.split(k4)
    B3, C3 = 48, 64
    inputs3 = jax.random.normal(k5, (B3, C3), dtype=jnp.float32).astype(jnp.bfloat16)
    target3 = jax.random.randint(k6, (B3,), 0, C3, dtype=jnp.int32)
    loss3 = jax.block_until_ready(asl_single_label(inputs3, target3))
    ref3 = _reference(inputs3.astype(jnp.float32), target3)
    np.testing.assert_allclose(np.asarray(loss3), np.asarray(ref3),
                               rtol=1e-4, atol=1e-4)

    # Test 4: nonzero gamma_pos integer path (exercises the prob branch).
    loss4 = jax.block_until_ready(
        asl_single_label(inputs, target, gamma_pos=1.0, gamma_neg=4.0))
    ref4 = _reference(inputs, target, gamma_pos=1.0, gamma_neg=4.0)
    np.testing.assert_allclose(np.asarray(loss4), np.asarray(ref4),
                               rtol=1e-5, atol=1e-5)

    print("KERNEL_OK")
</pallas_src>

<mosaic_0001>
module attributes {stable_mosaic.version = 11 : i64} {
  func.func @_asl_kernel(%arg0: i32, %arg1: memref<8x32xf32, #tpu.memory_space<vmem>>, %arg2: memref<8x1xi32, #tpu.memory_space<vmem>>, %arg3: memref<1x8x128xf32, #tpu.memory_space<vmem>>) attributes {dimension_semantics = [#tpu.dimension_semantics<parallel>], iteration_bounds = array<i64: 1>, scalar_prefetch = 0 : i64, scratch_operands = 0 : i64, tpu.core_type = #tpu.core_type<tc>, window_params = [{transform_indices = @transform_0, window_bounds = array<i64: 8, 32>}, {transform_indices = @transform_1, window_bounds = array<i64: 8, 1>}, {transform_indices = @transform_2, window_bounds = array<i64: 1, 8, 128>}]} {
    %c0 = arith.constant 0 : index
    %c0_0 = arith.constant 0 : index
    %0 = vector.load %arg1[%c0, %c0_0] : memref<8x32xf32, #tpu.memory_space<vmem>>, vector<8x32xf32>
    %c0_1 = arith.constant 0 : index
    %c0_2 = arith.constant 0 : index
    %1 = vector.load %arg2[%c0_1, %c0_2] : memref<8x1xi32, #tpu.memory_space<vmem>>, vector<8x1xi32>
    %cst = arith.constant dense<0xFF800000> : vector<8xf32>
    %2 = vector.multi_reduction <maximumf>, %0, %cst [1] : vector<8x32xf32> to vector<8xf32>
    %3 = vector.shape_cast %2 : vector<8xf32> to vector<8x1xf32>
    %4 = vector.broadcast %3 : vector<8x1xf32> to vector<8x32xf32>
    %5 = arith.subf %0, %4 : vector<8x32xf32>
    %6 = math.exp %5 : vector<8x32xf32>
    %cst_3 = arith.constant dense<0.000000e+00> : vector<8xf32>
    %7 = vector.multi_reduction <add>, %6, %cst_3 [1] : vector<8x32xf32> to vector<8xf32>
    %8 = vector.shape_cast %7 : vector<8xf32> to vector<8x1xf32>
    %9 = tpu.reciprocal %8 : vector<8x1xf32> -> vector<8x1xf32>
    %10 = math.log %8 : vector<8x1xf32>
    %11 = vector.broadcast %10 : vector<8x1xf32> to vector<8x32xf32>
    %12 = arith.subf %5, %11 : vector<8x32xf32>
    %13 = tpu.iota {dimensions = array<i32: 1>} : vector<8x32xi32>
    %14 = vector.broadcast %1 : vector<8x1xi32> to vector<8x32xi32>
    %15 = arith.cmpi eq, %13, %14 : vector<8x32xi32>
    %16 = arith.mulf %8, %8 : vector<8x1xf32>
    %17 = arith.mulf %16, %16 : vector<8x1xf32>
    %18 = arith.mulf %9, %9 : vector<8x1xf32>
    %19 = arith.mulf %18, %18 : vector<8x1xf32>
    %cst_4 = arith.constant 2.890000e+02 : f32
    %20 = vector.broadcast %cst_4 : f32 to vector<8x1xf32>
    %21 = arith.mulf %20, %17 : vector<8x1xf32>
    %22 = arith.mulf %6, %6 : vector<8x32xf32>
    %23 = arith.mulf %22, %22 : vector<8x32xf32>
    %24 = vector.shape_cast %21 : vector<8x1xf32> to vector<8x1xf32>
    %25 = vector.broadcast %24 : vector<8x1xf32> to vector<8x32xf32>
    %26 = arith.select %15, %25, %23 : vector<8x32xi1>, vector<8x32xf32>
    %27 = arith.mulf %26, %12 : vector<8x32xf32>
    %cst_5 = arith.constant dense<0.000000e+00> : vector<8xf32>
    %28 = vector.multi_reduction <add>, %27, %cst_5 [1] : vector<8x32xf32> to vector<8xf32>
    %29 = vector.shape_cast %28 : vector<8xf32> to vector<8x1xf32>
    %30 = arith.mulf %29, %19 : vector<8x1xf32>
    %cst_6 = arith.constant -3.125000e-03 : f32
    %31 = vector.broadcast %cst_6 : f32 to vector<8x1xf32>
    %32 = arith.mulf %31, %30 : vector<8x1xf32>
    %c8_i32 = arith.constant 8 : i32
    %33 = arith.muli %arg0, %c8_i32 : i32
    %34 = tpu.iota {dimensions = array<i32: 0>} : vector<8x1xi32>
    %35 = vector.broadcast %33 : i32 to vector<8x1xi32>
    %36 = arith.addi %35, %34 : vector<8x1xi32>
    %c8_i32_7 = arith.constant 8 : i32
    %37 = vector.broadcast %c8_i32_7 : i32 to vector<8x1xi32>
    %38 = arith.cmpi slt, %36, %37 : vector<8x1xi32>
    %cst_8 = arith.constant 0.000000e+00 : f32
    %39 = vector.broadcast %cst_8 : f32 to vector<8x1xf32>
    %40 = arith.select %38, %32, %39 : vector<8x1xi1>, vector<8x1xf32>
    %41 = vector.shape_cast %40 : vector<8x1xf32> to vector<1x8x1xf32>
    %cst_9 = arith.constant dense<0.000000e+00> : vector<1xf32>
    %42 = vector.multi_reduction <add>, %41, %cst_9 [1, 2] : vector<1x8x1xf32> to vector<1xf32>
    %43 = vector.shape_cast %42 : vector<1xf32> to vector<1x1x1xf32>
    %44 = vector.extract %43[0, 0, 0] : f32 from vector<1x1x1xf32>
    %45 = vector.broadcast %44 : f32 to vector<1x1x1xf32>
    %46 = vector.shape_cast %45 : vector<1x1x1xf32> to vector<1x1x1xf32>
    %47 = vector.broadcast %46 : vector<1x1x1xf32> to vector<1x8x128xf32>
    %c0_10 = arith.constant 0 : index
    %c0_11 = arith.constant 0 : index
    %c0_12 = arith.constant 0 : index
    %48 = vector.load %arg3[%c0_10, %c0_11, %c0_12] : memref<1x8x128xf32, #tpu.memory_space<vmem>>, vector<1x8x128xf32>
    tpu.vector_store %arg3[%c0_10, %c0_11, %c0_12], %47 {strides = array<i32>} : memref<1x8x128xf32, #tpu.memory_space<vmem>>, vector<1x8x128xf32>,
    return
  }
  func.func @transform_0(%arg0: i32) -> (i32, i32) {
    %c0_i32 = arith.constant 0 : i32
    %c0_i32_0 = arith.constant 0 : i32
    return %arg0, %c0_i32 : i32, i32
  }
  func.func @transform_1(%arg0: i32) -> (i32, i32) {
    %c0_i32 = arith.constant 0 : i32
    %c0_i32_0 = arith.constant 0 : i32
    return %arg0, %c0_i32 : i32, i32
  }
  func.func @transform_2(%arg0: i32) -> (i32, i32, i32) {
    %c0_i32 = arith.constant 0 : i32
    %c0_i32_0 = arith.constant 0 : i32
    %c0_i32_1 = arith.constant 0 : i32
    return %arg0, %c0_i32, %c0_i32_0 : i32, i32, i32
  }
}

</mosaic_0001>

<bundles_post_ra>
// kernel: tpu_custom_call.1
= control target key start
LH: loop header
LB: loop body
LE: loop exit
PB: predicated region body
PF: predicated region fallthrough
CT: control target
= control target key end

     0   :  { %vm14_vm0 = vcmask 261120   ;;  %s145_s0 = inlined_call_operand.vmem [shape: f32[8,32], index: 0, kind: input, shape index: {}]   ;;  %s146_s1 = inlined_call_operand.vmem [shape: s32[8,1], index: 1, kind: input, shape index: {}]   ;;  %s147_s2 = inlined_call_operand.hbm [shape: f32[1,8,128], index: 2, kind: output, shape index: {}]  }
   0x1   :  { %v12_v0 = vld [vmem:[%s145_s0] sm:$0xff] }
   0x2   :  { %7 = vsyncpa [#allocation3], 0  ;;  %v15_v1 = vsel %vm14_vm0, %v12_v0, -inf  ;;  %v13_v2 = vld [vmem:[%s146_s1] sm:$0xff]  ;;  %v116_v3 = vmov 0   ;;  %v28_v11 = vlaneseq  ;;  %vm55_vm2 = vcmask 7168  }
   0x3   :  { %16 = vmax.xlane.f32.xlu0 %v15_v1  ;;  %86 = vset.pattern.permute.xlu1 %v116_v3  ;;  %s117_s0 = smov [#allocation2]  }
   0x4   :  { %87 = vset.pattern.permute.xlu0 %v116_v3  ;;  %31 = vperm.xlu1 %86, %v13_v2   ;;  %v29_v13 = vand.u32 127, %v28_v11  ;;  %s74_s1 = sshll.u32 %s117_s0, 4  ;;  %s75_s1 = int_to_ptr.vmem [resolvable:$true] %s74_s1 }
   0x5   :  { %s94_s14 = scalar_lea.vmem %s75_s1, 128  ;;  %p99_p1 = scmp.lt.s32.totalorder %s75_s1, %s75_s1 }
   0x6   :  { %p95_p0 = scmp.ne.s32.totalorder %s75_s1, %s94_s14  ;;  %p100_p2 = scmp.lt.s32.totalorder %s94_s14, %s94_s14 }
   0x8   :  { %p101_p3 = por %p100_p2, %p99_p1 }
   0xa   :  { %p102_p4 = pnand %p101_p3, %p95_p0 }
  0x7f   :  { %v32_v14 = vpop.permute.xlu1 %31 }
  0x80   :  { %vm33_vm1 = vcmp.eq.s32.totalorder %v29_v13, %v32_v14 }
  0x8c   :  { %v17_v4 = vpop.xlane.xlu0 %16 }
  0x8d   :  { %v18_v5 = vsub.f32 %v12_v0, %v17_v4 }
  0x8f   :  { %v19_v6 = vmul.f32 1.442695, %v18_v5 }
  0x91   :  { %88 = vpow2.f32 %v19_v6 }
  0x9e   :  { %v89_v7 = vpop.eup %88 }
  0x9f   :  { %v21_v8 = vsel %vm14_vm0, %v89_v7, 0.0  ;;  %v39_v15 = vmul.f32 %v89_v7, %v89_v7 }
  0xa0   :  { %22 = vadd.xlane.f32.xlu0 %v21_v8 }
  0xa1   :  { %v40_v19 = vmul.f32 %v39_v15, %v39_v15 }
 0x129   :  { %v23_v9 = vpop.xlane.xlu0 %22 }
 0x12a   :  { %90 = vlog2.f32 %v23_v9  ;;  %v34_v10 = vmul.f32 %v23_v9, %v23_v9 }
 0x12b   :  { %92 = vrcp.f32 %v23_v9 }
 0x12c   :  { %v35_v12 = vmul.f32 %v34_v10, %v34_v10 }
 0x12e   :  { %v38_v17 = vmul.f32 289.0, %v35_v12 }
 0x130   :  { %v41_v21 = vsel %vm33_vm1, %v38_v17, %v40_v19 }
 0x137   :  { %v91_v16 = vpop.eup %90 }
 0x138   :  { %v26_v18 = vmul.f32 0.6931472, %v91_v16  ;;  %v93_v24 = vpop.eup %92 }
 0x139   :  { %v36_v25 = vmul.f32 %v93_v24, %v93_v24 }
 0x13a   :  { %v27_v20 = vsub.f32 %v18_v5, %v26_v18 }
 0x13b   :  { %v37_v26 = vmul.f32 %v36_v25, %v36_v25 }
 0x13c   :  { %v42_v22 = vmul.f32 %v41_v21, %v27_v20 }
 0x13e   :  { %v43_v23 = vsel %vm14_vm0, %v42_v22, 0.0 }
 0x13f   :  { %44 = vadd.xlane.f32.xlu1 %v43_v23 }
 0x1c8   :  { %v45_v27 = vpop.xlane.xlu1 %44 }
 0x1c9   :  { %v46_v28 = vmul.f32 %v45_v27, %v37_v26 }
 0x1cb   :  { %v47_v29 = vmul.f32 -0.003125, %v46_v28 }
 0x1cd   :  { %v56_v30 = vsel %vm55_vm2, %v47_v29, 0.0 }
 0x1ce   :  { %57 = vadd.xlane.f32.xlu0 %v56_v30 }
 0x257   :  { %v58_v31 = vpop.xlane.xlu0 %57 }
 0x258   :  { %v59_v32 = vrot.slane %v58_v31, 4 }
 0x25a   :  { %v60_v33 = vadd.f32 %v59_v32, %v58_v31 }
 0x25c   :  { %v61_v34 = vrot.slane %v60_v33, 2 }
 0x25e   :  { %v62_v35 = vadd.f32 %v61_v34, %v60_v33 }
 0x260   :  { %v63_v36 = vrot.slane %v62_v35, 1 }
 0x262   :  { %v64_v37 = vadd.f32 %v63_v36, %v62_v35 }
 0x264   :  { %82 = vpush %v64_v37 }
 0x295   :  { %s83_s13 = spop %82 }
 0x296   :  { %v66_v38 = vstv %s83_s13 }
 0x297   :  { %67 = vst [vmem:[#allocation2] sm:$0xff] %v66_v38 }
 0x298   :  { %105 = shalt.err (!%p102_p4)
}
 0x299   :  { %77 = dma.vmem_to_hbm [thread:$0]  %s75_s1, 128, %s147_s2, [#allocation3]  }
 0x29a   :  { %114 = dma.done.wait [#allocation3], 128  }
 0x29b   :  { %115 = vsyncadd [#allocation3], 4294967168 }
 0x29c   :  { %81 = vsyncpa [#allocation3], 1 }

</bundles_post_ra>
